<compile_context>
chip_gen: v7x
topology: tpu7x:2x2x1
jax: 0.10.0
libtpu: 0.0.40
codegen_flags: <defaults>
</compile_context>

<pallas_src>
import jax
import jax.numpy as jnp
from jax.experimental import pallas as pl
from jax.experimental.pallas import tpu as pltpu

HIDDEN = 256  # hard-wired by the PyTorch module


def _round_up(x, m):
    return (x + m - 1) // m * m


def qnetwork_flat_kernel(s_ref, a_ref,
                         ws1_ref, wa1_ref, b1_ref,
                         w2_ref, b2_ref,
                         w3_ref, b3_ref,
                         out_ref):
    """One batch tile of the fused twin-Q MLP (both heads at once)."""
    # Layer 1 (+ fused state/action concat): two small-K matmuls, f32 accumulation.
    h = (jnp.dot(s_ref[...], ws1_ref[...], preferred_element_type=jnp.float32)
         + jnp.dot(a_ref[...], wa1_ref[...], preferred_element_type=jnp.float32)
         + b1_ref[...])
    h = jnp.maximum(h, 0.0).astype(jnp.bfloat16)          # [TB, 2H]

    # Layer 2: block-diagonal(w2, w5) keeps the two heads independent.
    h = jnp.dot(h, w2_ref[...], preferred_element_type=jnp.float32) + b2_ref[...]
    h = jnp.maximum(h, 0.0).astype(jnp.bfloat16)          # [TB, 2H]

    # Layer 3: block-diagonal(w3, w6) -> both Q values in one [TB, 2] slab.
    q = jnp.dot(h, w3_ref[...], preferred_element_type=jnp.float32) + b3_ref[...]
    out_ref[...] = q.astype(out_ref.dtype)                # [TB, 2]


def prepare_params(params, state_dim):
    """Fuse the twin heads into one widened network and cast weights to bf16."""
    h = HIDDEN
    w14 = jnp.concatenate([params["w1"], params["w4"]], axis=1)   # [in_dim, 2H]
    ws1 = w14[:state_dim]                                         # [sd, 2H]
    wa1 = w14[state_dim:]                                         # [ad, 2H]
    b1 = jnp.concatenate([params["b1"], params["b4"]], axis=1)    # [1, 2H]

    w2f = jnp.zeros((2 * h, 2 * h), jnp.float32)
    w2f = w2f.at[:h, :h].set(params["w2"]).at[h:, h:].set(params["w5"])
    b2 = jnp.concatenate([params["b2"], params["b5"]], axis=1)    # [1, 2H]

    w3f = jnp.zeros((2 * h, 2), jnp.float32)
    w3f = w3f.at[:h, 0:1].set(params["w3"]).at[h:, 1:2].set(params["w6"])
    b3 = jnp.concatenate([params["b3"], params["b6"]], axis=1)    # [1, 2]

    bf16 = jnp.bfloat16
    return dict(ws1=ws1.astype(bf16), wa1=wa1.astype(bf16), b1=b1,
                w2=w2f.astype(bf16), b2=b2,
                w3=w3f.astype(bf16), b3=b3)


def qnetwork_flat_forward(state, action, prep, *, batch_tile=256):
    """Returns (q1, q2), each [batch, 1] float32, matching the PyTorch forward."""
    batch, state_dim = state.shape
    action_dim = action.shape[1]

    # bf16 activations feeding the MXU; f32 accumulation happens in the kernel.
    state = state.astype(jnp.bfloat16)
    action = action.astype(jnp.bfloat16)

    # Batch tile: multiple of 8 sublanes; pad the batch so the grid divides evenly.
    tb = min(batch_tile, _round_up(batch, 8))
    padded = _round_up(batch, tb)
    if padded != batch:
        pad = padded - batch
        state = jnp.pad(state, ((0, pad), (0, 0)))
        action = jnp.pad(action, ((0, pad), (0, 0)))
    grid = (padded // tb,)

    def batch_spec(feat):
        return pl.BlockSpec((tb, feat), lambda i: (i, 0))

    def resident_spec(shape):
        # Same block every grid step -> stays resident in VMEM (no re-DMA per tile).
        return pl.BlockSpec(shape, lambda i: (0, 0))

    in_specs = [
        batch_spec(state_dim),
        batch_spec(action_dim),
        resident_spec(prep["ws1"].shape),
        resident_spec(prep["wa1"].shape),
        resident_spec(prep["b1"].shape),
        resident_spec(prep["w2"].shape),
        resident_spec(prep["b2"].shape),
        resident_spec(prep["w3"].shape),
        resident_spec(prep["b3"].shape),
    ]

    q = pl.pallas_call(
        qnetwork_flat_kernel,
        out_shape=jax.ShapeDtypeStruct((padded, 2), jnp.float32),
        grid=grid,
        in_specs=in_specs,
        out_specs=batch_spec(2),
        compiler_params=pltpu.CompilerParams(
            dimension_semantics=("parallel",)),  # shard batch tiles across v7x's 2 TCs
    )(state, action,
      prep["ws1"], prep["wa1"], prep["b1"],
      prep["w2"], prep["b2"], prep["w3"], prep["b3"])

    q = q[:batch]
    return q[:, 0:1], q[:, 1:2]


# ---------------- parameter init (matches weights_init_) ----------------

def xavier_uniform(key, fan_in, fan_out, gain=1.0):
    # torch.nn.init.xavier_uniform_ on a [out, in] weight; built directly as [in, out].
    bound = gain * jnp.sqrt(6.0 / (fan_in + fan_out))
    return jax.random.uniform(key, (fan_in, fan_out), jnp.float32,
                              minval=-bound, maxval=bound)


def init_params(key, in_dim, hidden=HIDDEN):
    keys = jax.random.split(key, 6)
    dims = [(in_dim, hidden), (hidden, hidden), (hidden, 1),
            (in_dim, hidden), (hidden, hidden), (hidden, 1)]
    params = {}
    for i, ((fi, fo), k) in enumerate(zip(dims, keys), start=1):
        params[f"w{i}"] = xavier_uniform(k, fi, fo)
        params[f"b{i}"] = jnp.zeros((1, fo), jnp.float32)  # constant_(bias, 0)
    return params


# ---------------- pure-JAX reference (same bf16/f32-accum precision) ----------------

def reference_forward(state, action, params):
    bf16 = jnp.bfloat16
    xu = jnp.concatenate([state.astype(bf16), action.astype(bf16)], axis=1)

    def head(wa, ba, wb, bb, wc, bc):
        h = jnp.dot(xu, wa.astype(bf16), preferred_element_type=jnp.float32) + ba
        h = jnp.maximum(h, 0.0).astype(bf16)
        h = jnp.dot(h, wb.astype(bf16), preferred_element_type=jnp.float32) + bb
        h = jnp.maximum(h, 0.0).astype(bf16)
        return jnp.dot(h, wc.astype(bf16), preferred_element_type=jnp.float32) + bc

    q1 = head(params["w1"], params["b1"], params["w2"], params["b2"],
              params["w3"], params["b3"])
    q2 = head(params["w4"], params["b4"], params["w5"], params["b5"],
              params["w6"], params["b6"])
    return q1, q2


if __name__ == "__main__":
    # env_params consistent with the module: input dim = obs + 2*goal + action.
    env_params = {"obs": 10, "goal": 3, "action": 4}
    state_dim = env_params["obs"] + 2 * env_params["goal"]   # 16 (state includes goals)
    action_dim = env_params["action"]                        # 4
    in_dim = state_dim + action_dim                          # 20

    key = jax.random.PRNGKey(0)
    k_s, k_a, k_p, k_s2, k_a2 = jax.random.split(key, 5)
    params = init_params(k_p, in_dim)
    prep = prepare_params(params, state_dim)

    # --- small batch (single grid step) ---
    batch = 8
    state = jax.random.normal(k_s, (batch, state_dim), jnp.float32)
    action = jax.random.normal(k_a, (batch, action_dim), jnp.float32)
    q1, q2 = qnetwork_flat_forward(state, action, prep)
    jax.block_until_ready((q1, q2))
    r1, r2 = reference_forward(state, action, params)
    assert q1.shape == (batch, 1) and q2.shape == (batch, 1)
    assert bool(jnp.allclose(q1, r1, atol=2e-3, rtol=2e-3))
    assert bool(jnp.allclose(q2, r2, atol=2e-3, rtol=2e-3))

    # --- larger, non-divisible batch (multi-step grid + padding path) ---
    batch2 = 300
    state2 = jax.random.normal(k_s2, (batch2, state_dim), jnp.float32)
    action2 = jax.random.normal(k_a2, (batch2, action_dim), jnp.float32)
    q1b, q2b = qnetwork_flat_forward(state2, action2, prep, batch_tile=256)
    jax.block_until_ready((q1b, q2b))
    r1b, r2b = reference_forward(state2, action2, params)
    assert q1b.shape == (batch2, 1) and q2b.shape == (batch2, 1)
    assert bool(jnp.allclose(q1b, r1b, atol=2e-3, rtol=2e-3))
    assert bool(jnp.allclose(q2b, r2b, atol=2e-3, rtol=2e-3))

    print("KERNEL_OK")
</pallas_src>

<mosaic_0001>
module attributes {stable_mosaic.version = 11 : i64} {
  func.func @qnetwork_flat_kernel(%arg0: i32, %arg1: memref<8x16xbf16, #tpu.memory_space<vmem>>, %arg2: memref<8x4xbf16, #tpu.memory_space<vmem>>, %arg3: memref<16x512xbf16, #tpu.memory_space<vmem>>, %arg4: memref<4x512xbf16, #tpu.memory_space<vmem>>, %arg5: memref<1x512xf32, #tpu.memory_space<vmem>>, %arg6: memref<512x512xbf16, #tpu.memory_space<vmem>>, %arg7: memref<1x512xf32, #tpu.memory_space<vmem>>, %arg8: memref<512x2xbf16, #tpu.memory_space<vmem>>, %arg9: memref<1x2xf32, #tpu.memory_space<vmem>>, %arg10: memref<8x2xf32, #tpu.memory_space<vmem>>) attributes {dimension_semantics = [#tpu.dimension_semantics<parallel>], iteration_bounds = array<i64: 1>, scalar_prefetch = 0 : i64, scratch_operands = 0 : i64, tpu.core_type = #tpu.core_type<tc>, window_params = [{transform_indices = @transform_0, window_bounds = array<i64: 8, 16>}, {transform_indices = @transform_1, window_bounds = array<i64: 8, 4>}, {pipeline_mode = #tpu.pipeline_mode<synchronous>, transform_indices = @transform_2, window_bounds = array<i64: 16, 512>}, {pipeline_mode = #tpu.pipeline_mode<synchronous>, transform_indices = @transform_3, window_bounds = array<i64: 4, 512>}, {pipeline_mode = #tpu.pipeline_mode<synchronous>, transform_indices = @transform_4, window_bounds = array<i64: 1, 512>}, {pipeline_mode = #tpu.pipeline_mode<synchronous>, transform_indices = @transform_5, window_bounds = array<i64: 512, 512>}, {pipeline_mode = #tpu.pipeline_mode<synchronous>, transform_indices = @transform_6, window_bounds = array<i64: 1, 512>}, {pipeline_mode = #tpu.pipeline_mode<synchronous>, transform_indices = @transform_7, window_bounds = array<i64: 512, 2>}, {pipeline_mode = #tpu.pipeline_mode<synchronous>, transform_indices = @transform_8, window_bounds = array<i64: 1, 2>}, {transform_indices = @transform_9, window_bounds = array<i64: 8, 2>}]} {
    %c0 = arith.constant 0 : index
    %c0_0 = arith.constant 0 : index
    %0 = vector.load %arg1[%c0, %c0_0] : memref<8x16xbf16, #tpu.memory_space<vmem>>, vector<8x16xbf16>
    %c0_1 = arith.constant 0 : index
    %c0_2 = arith.constant 0 : index
    %1 = vector.load %arg3[%c0_1, %c0_2] : memref<16x512xbf16, #tpu.memory_space<vmem>>, vector<16x512xbf16>
    %cst = arith.constant dense<0.000000e+00> : vector<8x512xf32>
    %2 = tpu.matmul %0, %1, %cst {dimension_numbers = #tpu.dot_dimension_numbers<[1], [0], [0], [1], [0, 0, 1, 1], [], []>} : vector<8x16xbf16>, vector<16x512xbf16>, vector<8x512xf32> -> vector<8x512xf32>
    %c0_3 = arith.constant 0 : index
    %c0_4 = arith.constant 0 : index
    %3 = vector.load %arg2[%c0_3, %c0_4] : memref<8x4xbf16, #tpu.memory_space<vmem>>, vector<8x4xbf16>
    %c0_5 = arith.constant 0 : index
    %c0_6 = arith.constant 0 : index
    %4 = vector.load %arg4[%c0_5, %c0_6] : memref<4x512xbf16, #tpu.memory_space<vmem>>, vector<4x512xbf16>
    %cst_7 = arith.constant dense<0.000000e+00> : vector<8x512xf32>
    %5 = tpu.matmul %3, %4, %cst_7 {dimension_numbers = #tpu.dot_dimension_numbers<[1], [0], [0], [1], [0, 0, 1, 1], [], []>} : vector<8x4xbf16>, vector<4x512xbf16>, vector<8x512xf32> -> vector<8x512xf32>
    %6 = arith.addf %2, %5 : vector<8x512xf32>
    %c0_8 = arith.constant 0 : index
    %c0_9 = arith.constant 0 : index
    %7 = vector.load %arg5[%c0_8, %c0_9] : memref<1x512xf32, #tpu.memory_space<vmem>>, vector<1x512xf32>
    %8 = vector.broadcast %7 : vector<1x512xf32> to vector<8x512xf32>
    %9 = arith.addf %6, %8 : vector<8x512xf32>
    %cst_10 = arith.constant 0.000000e+00 : f32
    %10 = vector.broadcast %cst_10 : f32 to vector<8x512xf32>
    %11 = arith.maximumf %9, %10 : vector<8x512xf32>
    %12 = arith.truncf %11 : vector<8x512xf32> to vector<8x512xbf16>
    %c0_11 = arith.constant 0 : index
    %c0_12 = arith.constant 0 : index
    %13 = vector.load %arg6[%c0_11, %c0_12] : memref<512x512xbf16, #tpu.memory_space<vmem>>, vector<512x512xbf16>
    %cst_13 = arith.constant dense<0.000000e+00> : vector<8x512xf32>
    %14 = tpu.matmul %12, %13, %cst_13 {dimension_numbers = #tpu.dot_dimension_numbers<[1], [0], [0], [1], [0, 0, 1, 1], [], []>} : vector<8x512xbf16>, vector<512x512xbf16>, vector<8x512xf32> -> vector<8x512xf32>
    %c0_14 = arith.constant 0 : index
    %c0_15 = arith.constant 0 : index
    %15 = vector.load %arg7[%c0_14, %c0_15] : memref<1x512xf32, #tpu.memory_space<vmem>>, vector<1x512xf32>
    %16 = vector.broadcast %15 : vector<1x512xf32> to vector<8x512xf32>
    %17 = arith.addf %14, %16 : vector<8x512xf32>
    %cst_16 = arith.constant 0.000000e+00 : f32
    %18 = vector.broadcast %cst_16 : f32 to vector<8x512xf32>
    %19 = arith.maximumf %17, %18 : vector<8x512xf32>
    %20 = arith.truncf %19 : vector<8x512xf32> to vector<8x512xbf16>
    %c0_17 = arith.constant 0 : index
    %c0_18 = arith.constant 0 : index
    %21 = vector.load %arg8[%c0_17, %c0_18] : memref<512x2xbf16, #tpu.memory_space<vmem>>, vector<512x2xbf16>
    %cst_19 = arith.constant dense<0.000000e+00> : vector<8x2xf32>
    %22 = tpu.matmul %20, %21, %cst_19 {dimension_numbers = #tpu.dot_dimension_numbers<[1], [0], [0], [1], [0, 0, 1, 1], [], []>} : vector<8x512xbf16>, vector<512x2xbf16>, vector<8x2xf32> -> vector<8x2xf32>
    %c0_20 = arith.constant 0 : index
    %c0_21 = arith.constant 0 : index
    %23 = vector.load %arg9[%c0_20, %c0_21] : memref<1x2xf32, #tpu.memory_space<vmem>>, vector<1x2xf32>
    %24 = vector.broadcast %23 : vector<1x2xf32> to vector<8x2xf32>
    %25 = arith.addf %22, %24 : vector<8x2xf32>
    %c0_22 = arith.constant 0 : index
    %c0_23 = arith.constant 0 : index
    %26 = vector.load %arg10[%c0_22, %c0_23] : memref<8x2xf32, #tpu.memory_space<vmem>>, vector<8x2xf32>
    tpu.vector_store %arg10[%c0_22, %c0_23], %25 {strides = array<i32>} : memref<8x2xf32, #tpu.memory_space<vmem>>, vector<8x2xf32>,
    return
  }
  func.func @transform_0(%arg0: i32) -> (i32, i32) {
    %c0_i32 = arith.constant 0 : i32
    %c0_i32_0 = arith.constant 0 : i32
    return %arg0, %c0_i32 : i32, i32
  }
  func.func @transform_1(%arg0: i32) -> (i32, i32) {
    %c0_i32 = arith.constant 0 : i32
    %c0_i32_0 = arith.constant 0 : i32
    return %arg0, %c0_i32 : i32, i32
  }
  func.func @transform_2(%arg0: i32) -> (i32, i32) {
    %c0_i32 = arith.constant 0 : i32
    %c0_i32_0 = arith.constant 0 : i32
    %c0_i32_1 = arith.constant 0 : i32
    return %c0_i32, %c0_i32_0 : i32, i32
  }
  func.func @transform_3(%arg0: i32) -> (i32, i32) {
    %c0_i32 = arith.constant 0 : i32
    %c0_i32_0 = arith.constant 0 : i32
    %c0_i32_1 = arith.constant 0 : i32
    return %c0_i32, %c0_i32_0 : i32, i32
  }
  func.func @transform_4(%arg0: i32) -> (i32, i32) {
    %c0_i32 = arith.constant 0 : i32
    %c0_i32_0 = arith.constant 0 : i32
    %c0_i32_1 = arith.constant 0 : i32
    return %c0_i32, %c0_i32_0 : i32, i32
  }
  func.func @transform_5(%arg0: i32) -> (i32, i32) {
    %c0_i32 = arith.constant 0 : i32
    %c0_i32_0 = arith.constant 0 : i32
    %c0_i32_1 = arith.constant 0 : i32
    return %c0_i32, %c0_i32_0 : i32, i32
  }
  func.func @transform_6(%arg0: i32) -> (i32, i32) {
    %c0_i32 = arith.constant 0 : i32
    %c0_i32_0 = arith.constant 0 : i32
    %c0_i32_1 = arith.constant 0 : i32
    return %c0_i32, %c0_i32_0 : i32, i32
  }
  func.func @transform_7(%arg0: i32) -> (i32, i32) {
    %c0_i32 = arith.constant 0 : i32
    %c0_i32_0 = arith.constant 0 : i32
    %c0_i32_1 = arith.constant 0 : i32
    return %c0_i32, %c0_i32_0 : i32, i32
  }
  func.func @transform_8(%arg0: i32) -> (i32, i32) {
    %c0_i32 = arith.constant 0 : i32
    %c0_i32_0 = arith.constant 0 : i32
    %c0_i32_1 = arith.constant 0 : i32
    return %c0_i32, %c0_i32_0 : i32, i32
  }
  func.func @transform_9(%arg0: i32) -> (i32, i32) {
    %c0_i32 = arith.constant 0 : i32
    %c0_i32_0 = arith.constant 0 : i32
    return %arg0, %c0_i32 : i32, i32
  }
}

</mosaic_0001>

<bundles_post_ra>
// kernel: tpu_custom_call.1
= control target key start
LH: loop header
LB: loop body
LE: loop exit
PB: predicated region body
PF: predicated region fallthrough
CT: control target
= control target key end

     0   :  { %14 = vsyncpa [#allocation3], 0  ;;  %s2110_s30 = smov [#allocation2]   ;;  %s2336_s0 = inlined_call_operand.vmem [shape: bf16[8,16], index: 0, kind: input, shape index: {}]   ;;  %s2337_s1 = inlined_call_operand.vmem [shape: bf16[8,4], index: 1, kind: input, shape index: {}]   ;;  %s2338_s2 = inlined_call_operand.vmem [shape: bf16[16,512], index: 2, kind: input, shape index: {}]   ;;  %s2339_s3 = inlined_call_operand.vmem [shape: bf16[4,512], index: 3, kind: input, shape index: {}]   ;;  %s2340_s4 = inlined_call_operand.vmem [shape: f32[1,512], index: 4, kind: input, shape index: {}]   ;;  %s2341_s5 = inlined_call_operand.hbm [shape: bf16[512,512], index: 5, kind: input, shape index: {}]   ;;  %s2342_s6 = inlined_call_operand.vmem [shape: f32[1,512], index: 6, kind: input, shape index: {}]   ;;  %s2343_s7 = inlined_call_operand.vmem [shape: bf16[512,2], index: 7, kind: input, shape index: {}]   ;;  %s2344_s8 = inlined_call_operand.vmem [shape: f32[1,2], index: 8, kind: input, shape index: {}]   ;;  %s2345_s9 = inlined_call_operand.vmem [shape: f32[8,2], index: 9, kind: output, shape index: {}]  }
   0x1   :  { %s30_s10 = sshll.u32 %s2110_s30, 4  ;;  %s2086_s13 = scalar_lea.hbm %s2341_s5, 16384  ;;  %s31_s10 = int_to_ptr.vmem [resolvable:$true] %s30_s10 }
   0x2   :  { %p2087_p0 = scmp.ne.s32.totalorder %s2341_s5, %s2086_s13  ;;  %p2090_p1 = scmp.lt.u32.totalorder %s2086_s13, %s2341_s5 }
   0x4   :  { %p2092_p2 = pnand %p2090_p1, %p2087_p0 }
   0x6   :  { %2095 = shalt.err (!%p2092_p2)
}
   0x7   :  { %s2096_s18 = scalar_lea.vmem %s31_s10, 16384  ;;  %p2101_p4 = scmp.lt.s32.totalorder %s31_s10, %s31_s10 }
   0x8   :  { %p2097_p3 = scmp.ne.s32.totalorder %s31_s10, %s2096_s18  ;;  %p2102_p5 = scmp.lt.s32.totalorder %s2096_s18, %s2096_s18 }
   0xa   :  { %p2103_p6 = por %p2102_p5, %p2101_p4 }
   0xc   :  { %p2104_p7 = pnand %p2103_p6, %p2097_p3 }
   0xe   :  { %2107 = shalt.err (!%p2104_p7)
}
   0xf   :  { %s2111_s19 = smov 256   ;;  %s2112_s20 = smov 16  }
  0x10   :  { %36 = dma.hbm_to_vmem [thread:$0]  %s2341_s5, 16384, %s31_s10, [#allocation3], %s2111_s19, %s2111_s19, %s2112_s20  }
  0x11   :  { %2108 = dma.done.wait [#allocation3], 16384  }
  0x12   :  { %2109 = vsyncadd [#allocation3], 4294950912  ;;  %v59_v0 = vlaneseq  ;;  %v2113_v1 = vmov 1983009808   ;;  %v2114_v3 = vmov 0   ;;  %v53_v7 = vld [vmem:[%s2339_s3] sm:$0xff] }
  0x13   :  { %v57_v2 = vunpack.c.l.s4 %v2113_v1  ;;  %121 = vmatprep.mubr.bf16.mxu0 %v2114_v3  ;;  %162 = vmatprep.mubr.bf16.mxu1 %v2114_v3  ;;  %vm76_vm0 = vcmask 1041408   ;;  %v55_v9 = vcombine.high %v53_v7, %v53_v7  ;;  %v1857_v12 = vld [vmem:[%s2338_s2 + $0x4] ss:$16 sps:$4 sm:$0xff]   ;;  %v52_v14 = vld [vmem:[%s2337_s1] sm:$0xf]  ;;  %vm72_vm1 = vcmask 31744  }
  0x14   :  { %v2177_v4 = vshrl.u32 %v59_v0, 7  ;;  %v1861_v17 = vld [vmem:[%s2338_s2 + $0xc] ss:$16 sps:$4 sm:$0xff]   ;;  %v1855_v18 = vld [vmem:[%s2338_s2] ss:$16 sps:$4 sm:$0xff]   ;;  %vm191_vm2 = vcmask 130048  }
  0x15   :  { %v58_v5 = vunpack.c.0.s8 %v57_v2  ;;  %v1864_v19 = vld [vmem:[#allocation2 + $0x4] ss:$16 sps:$4 sm:$0xff]   ;;  %v1859_v20 = vld [vmem:[%s2338_s2 + $0x8] ss:$16 sps:$4 sm:$0xff]   ;;  %v1867_v21 = vld [vmem:[#allocation2 + $0xc] ss:$16 sps:$4 sm:$0xff]  }
  0x16   :  { %v47_v22 = vld [vmem:[%s2336_s0] sm:$0xf]  ;;  %v1870_v24 = vld [vmem:[#allocation2 + $0x24] ss:$16 sps:$4 sm:$0xff]   ;;  %v1865_v25 = vld [vmem:[#allocation2 + $0x8] ss:$16 sps:$4 sm:$0xff]  }
  0x17   :  { %v61_v6 = vsub.s32 %v58_v5, %v2177_v4  ;;  %v1862_v23 = vld [vmem:[#allocation2] ss:$16 sps:$4 sm:$0xff]   ;;  %v1873_v26 = vld [vmem:[#allocation2 + $0x2c] ss:$16 sps:$4 sm:$0xff]   ;;  %v1876_v28 = vld [vmem:[#allocation2 + $0x44] ss:$16 sps:$4 sm:$0xff]  }
  0x18   :  { %v1868_v27 = vld [vmem:[#allocation2 + $0x20] ss:$16 sps:$4 sm:$0xff]   ;;  %v1871_v29 = vld [vmem:[#allocation2 + $0x28] ss:$16 sps:$4 sm:$0xff]   ;;  %v1879_v30 = vld [vmem:[#allocation2 + $0x4c] ss:$16 sps:$4 sm:$0xff]  }
  0x19   :  { %v62_v8 = vrot.slane %v53_v7, %v61_v6  ;;  %v69_v13 = vrot.slane %v55_v9, %v61_v6  ;;  %v1874_v31 = vld [vmem:[#allocation2 + $0x40] ss:$16 sps:$4 sm:$0xff]   ;;  %v1882_v32 = vld [vmem:[#allocation2 + $0x64] ss:$16 sps:$4 sm:$0xff]   ;;  %v1877_v33 = vld [vmem:[#allocation2 + $0x48] ss:$16 sps:$4 sm:$0xff]  }
  0x1a   :  { %v1885_v34 = vld [vmem:[#allocation2 + $0x6c] ss:$16 sps:$4 sm:$0xff]   ;;  %v1880_v35 = vld [vmem:[#allocation2 + $0x60] ss:$16 sps:$4 sm:$0xff]   ;;  %v1888_v36 = vld [vmem:[#allocation2 + $0x84] ss:$16 sps:$4 sm:$0xff]  }
  0x1b   :  { %v70_v10 = vcombine.high %v62_v8, %v62_v8  ;;  %v78_v11 = vsel %vm76_vm0, %v62_v8, 0  ;;  %v71_v15 = vcombine.high %v69_v13, %v69_v13  ;;  %v84_v16 = vsel %vm76_vm0, %v69_v13, 0  ;;  %v1883_v37 = vld [vmem:[#allocation2 + $0x68] ss:$16 sps:$4 sm:$0xff]   ;;  %v1891_v38 = vld [vmem:[#allocation2 + $0x8c] ss:$16 sps:$4 sm:$0xff]  }
  0x1c   :  { %v1886_v39 = vld [vmem:[#allocation2 + $0x80] ss:$16 sps:$4 sm:$0xff]   ;;  %v1894_v40 = vld [vmem:[#allocation2 + $0xa4] ss:$16 sps:$4 sm:$0xff]   ;;  %v1889_v41 = vld [vmem:[#allocation2 + $0x88] ss:$16 sps:$4 sm:$0xff]  }
  0x1d   :  { %1623 = vmatprep.subr.msk.bf16.mxu0 %vm76_vm0, %v70_v10  ;;  %1625 = vmatprep.subr.msk.bf16.mxu1 %vm76_vm0, %v71_v15  ;;  %v1892_v42 = vld [vmem:[#allocation2 + $0xa0] ss:$16 sps:$4 sm:$0xff]   ;;  %v1897_v43 = vld [vmem:[#allocation2 + $0xac] ss:$16 sps:$4 sm:$0xff]   ;;  %v1895_v44 = vld [vmem:[#allocation2 + $0xa8] ss:$16 sps:$4 sm:$0xff]  }
  0x1e   :  { %90 = vmatpush1.bf16.msra.mxu0 %v78_v11  ;;  %131 = vmatpush1.bf16.msra.mxu1 %v84_v16  ;;  %v1900_v45 = vld [vmem:[#allocation2 + $0xc4] ss:$16 sps:$4 sm:$0xff]   ;;  %v1903_v46 = vld [vmem:[#allocation2 + $0xcc] ss:$16 sps:$4 sm:$0xff]   ;;  %v1898_v47 = vld [vmem:[#allocation2 + $0xc0] ss:$16 sps:$4 sm:$0xff]  }
  0x1f   :  { %195 = vmatprep.subr.bf16.mxu0 %v1857_v12  ;;  %236 = vmatprep.subr.bf16.mxu1 %v1861_v17  ;;  %v1906_v48 = vld [vmem:[#allocation2 + $0xe4] ss:$16 sps:$4 sm:$0xff]   ;;  %v1901_v49 = vld [vmem:[#allocation2 + $0xc8] ss:$16 sps:$4 sm:$0xff]   ;;  %v1909_v50 = vld [vmem:[#allocation2 + $0xec] ss:$16 sps:$4 sm:$0xff]  }
  0x20   :  { %v1904_v51 = vld [vmem:[#allocation2 + $0xe0] ss:$16 sps:$4 sm:$0xff]   ;;  %v1912_v52 = vld [vmem:[#allocation2 + $0x104] ss:$16 sps:$4 sm:$0xff]   ;;  %v1907_v53 = vld [vmem:[#allocation2 + $0xe8] ss:$16 sps:$4 sm:$0xff]  }
  0x21   :  { %1624 = vmatmul.mubr.msk.bf16.vlgmr.msra.gmra.mrb[0].mxu0 %vm72_vm1, %v52_v14  ;;  %1626 = vmatmul.mubr.msk.bf16.vlgmr.msra.gmra.mrb[0].mxu1 %vm72_vm1, %v52_v14  ;;  %v1915_v54 = vld [vmem:[#allocation2 + $0x10c] ss:$16 sps:$4 sm:$0xff]   ;;  %v1910_v55 = vld [vmem:[#allocation2 + $0x100] ss:$16 sps:$4 sm:$0xff]   ;;  %v1918_v56 = vld [vmem:[#allocation2 + $0x124] ss:$16 sps:$4 sm:$0xff]  }
  0x22   :  { %196 = vmatpush1.bf16.msra.mxu0 %v1855_v18  ;;  %227 = vmatprep.mubr.bf16.mxu0 %v2114_v3  ;;  %v1913_v57 = vld [vmem:[#allocation2 + $0x108] ss:$16 sps:$4 sm:$0xff]   ;;  %v1921_v58 = vld [vmem:[#allocation2 + $0x12c] ss:$16 sps:$4 sm:$0xff]   ;;  %v1916_v59 = vld [vmem:[#allocation2 + $0x120] ss:$16 sps:$4 sm:$0xff]  }
  0x23   :  { %1101 = vmatprep.subr.bf16.mxu0 %v1864_v19  ;;  %237 = vmatpush1.bf16.msra.mxu1 %v1859_v20  ;;  %v1924_v60 = vld [vmem:[#allocation2 + $0x144] ss:$16 sps:$4 sm:$0xff]   ;;  %v1919_v61 = vld [vmem:[#allocation2 + $0x128] ss:$16 sps:$4 sm:$0xff]   ;;  %v1927_v62 = vld [vmem:[#allocation2 + $0x14c] ss:$16 sps:$4 sm:$0xff]  }
  0x24   :  { %268 = vmatprep.mubr.bf16.mxu1 %v2114_v3  ;;  %1183 = vmatprep.subr.bf16.mxu1 %v1867_v21  ;;  %v1922_v63 = vld [vmem:[#allocation2 + $0x140] ss:$16 sps:$4 sm:$0xff]   ;;  %v1930_v0 = vld [vmem:[#allocation2 + $0x164] ss:$16 sps:$4 sm:$0xff]   ;;  %v1925_v1 = vld [vmem:[#allocation2 + $0x148] ss:$16 sps:$4 sm:$0xff]  }
  0x25   :  { %v1933_v2 = vld [vmem:[#allocation2 + $0x16c] ss:$16 sps:$4 sm:$0xff]   ;;  %v1928_v3 = vld [vmem:[#allocation2 + $0x160] ss:$16 sps:$4 sm:$0xff]   ;;  %v1931_v5 = vld [vmem:[#allocation2 + $0x168] ss:$16 sps:$4 sm:$0xff]  }
  0x26   :  { %v1936_v6 = vld [vmem:[#allocation2 + $0x184] ss:$16 sps:$4 sm:$0xff]   ;;  %v1939_v7 = vld [vmem:[#allocation2 + $0x18c] ss:$16 sps:$4 sm:$0xff]   ;;  %v1934_v8 = vld [vmem:[#allocation2 + $0x180] ss:$16 sps:$4 sm:$0xff]  }
  0x27   :  { %v1937_v9 = vld [vmem:[#allocation2 + $0x188] ss:$16 sps:$4 sm:$0xff]   ;;  %v1940_v10 = vld [vmem:[#allocation2 + $0x1a0] ss:$16 sps:$4 sm:$0xff]   ;;  %v1942_v11 = vld [vmem:[#allocation2 + $0x1a4] ss:$16 sps:$4 sm:$0xff]  }
  0x28   :  { %v1943_v12 = vld [vmem:[#allocation2 + $0x1a8] ss:$16 sps:$4 sm:$0xff]   ;;  %v1945_v13 = vld [vmem:[#allocation2 + $0x1ac] ss:$16 sps:$4 sm:$0xff]   ;;  %v1948_v14 = vld [vmem:[#allocation2 + $0x1c4] ss:$16 sps:$4 sm:$0xff]  }
  0x29   :  { %1631 = vmatmul.mubr.msk.bf16.vlgmr.msra.gmra.mrb[4].mxu0 %vm191_vm2, %v47_v22  ;;  %1632 = vmatmul.mubr.msk.bf16.vlgmr.msra.gmra.mrb[4].mxu1 %vm191_vm2, %v47_v22  ;;  %v1946_v15 = vld [vmem:[#allocation2 + $0x1c0] ss:$16 sps:$4 sm:$0xff]   ;;  %v1949_v16 = vld [vmem:[#allocation2 + $0x1c8] ss:$16 sps:$4 sm:$0xff]   ;;  %v1951_v17 = vld [vmem:[#allocation2 + $0x1cc] ss:$16 sps:$4 sm:$0xff]  }
  0x2a   :  { %1102 = vmatpush1.bf16.msra.mxu0 %v1862_v23  ;;  %1184 = vmatpush1.bf16.msra.mxu1 %v1865_v25  ;;  %v1954_v18 = vld [vmem:[#allocation2 + $0x1e4] ss:$16 sps:$4 sm:$0xff]   ;;  %v1957_v19 = vld [vmem:[#allocation2 + $0x1ec] ss:$16 sps:$4 sm:$0xff]   ;;  %v1952_v20 = vld [vmem:[#allocation2 + $0x1e0] ss:$16 sps:$4 sm:$0xff]  }
  0x2b   :  { %1103 = vmatprep.subr.bf16.mxu0 %v1870_v24  ;;  %1185 = vmatprep.subr.bf16.mxu1 %v1873_v26  ;;  %v1955_v21 = vld [vmem:[#allocation2 + $0x1e8] ss:$16 sps:$4 sm:$0xff]   ;;  %v1960_v22 = vld [vmem:[#allocation2 + $0x204] ss:$16 sps:$4 sm:$0xff]   ;;  %v1963_v23 = vld [vmem:[#allocation2 + $0x20c] ss:$16 sps:$4 sm:$0xff]  }
  0x2c   :  { %vm1616_vm3 = vcmask 15360  }
  0x2e   :  { %1104 = vmatpush1.bf16.msra.mxu0 %v1868_v27  ;;  %1186 = vmatpush1.bf16.msra.mxu1 %v1871_v29  ;;  %v281_v29 = vsub.s32 0, %v2177_v4 }
  0x2f   :  { %1105 = vmatprep.subr.bf16.mxu0 %v1876_v28  ;;  %1187 = vmatprep.subr.bf16.mxu1 %v1879_v30 }
  0x32   :  { %1106 = vmatpush1.bf16.msra.mxu0 %v1874_v31  ;;  %1188 = vmatpush1.bf16.msra.mxu1 %v1877_v33  ;;  %v277_v31 = vld [vmem:[%s2340_s4] sm:$0xf] }
  0x33   :  { %1107 = vmatprep.subr.bf16.mxu0 %v1882_v32  ;;  %1189 = vmatprep.subr.bf16.mxu1 %v1885_v34  ;;  %v285_v32 = vsub.s32 1, %v2177_v4 }
  0x36   :  { %1108 = vmatpush1.bf16.msra.mxu0 %v1880_v35  ;;  %1190 = vmatpush1.bf16.msra.mxu1 %v1883_v37  ;;  %v289_v35 = vsub.s32 2, %v2177_v4  ;;  %v282_v37 = vrot.slane %v277_v31, %v281_v29 }
  0x37   :  { %1109 = vmatprep.subr.bf16.mxu0 %v1888_v36  ;;  %1191 = vmatprep.subr.bf16.mxu1 %v1891_v38  ;;  %v293_v36 = vsub.s32 3, %v2177_v4 }
  0x3a   :  { %1110 = vmatpush1.bf16.msra.mxu0 %v1886_v39  ;;  %1192 = vmatpush1.bf16.msra.mxu1 %v1889_v41  ;;  %v286_v39 = vrot.slane %v277_v31, %v285_v32 }
  0x3b   :  { %1111 = vmatprep.subr.bf16.mxu0 %v1894_v40  ;;  %1193 = vmatprep.subr.bf16.mxu1 %v1897_v43 }
  0x3e   :  { %1112 = vmatpush1.bf16.msra.mxu0 %v1892_v42  ;;  %1194 = vmatpush1.bf16.msra.mxu1 %v1895_v44  ;;  %v290_v42 = vrot.slane %v277_v31, %v289_v35 }
  0x3f   :  { %1113 = vmatprep.subr.bf16.mxu0 %v1900_v45  ;;  %1195 = vmatprep.subr.bf16.mxu1 %v1903_v46  ;;  %v294_v46 = vrot.slane %v277_v31, %v293_v36  ;;  %v2008_v31 = vld [vmem:[#allocation2 + $0x304] ss:$16 sps:$4 sm:$0xff]  }
  0x42   :  { %1114 = vmatpush1.bf16.msra.mxu0 %v1898_v47  ;;  %1196 = vmatpush1.bf16.msra.mxu1 %v1901_v49 }
  0x43   :  { %1115 = vmatprep.subr.bf16.mxu0 %v1906_v48  ;;  %1197 = vmatprep.subr.bf16.mxu1 %v1909_v50 }
  0x46   :  { %1116 = vmatpush1.bf16.msra.mxu0 %v1904_v51  ;;  %1198 = vmatpush1.bf16.msra.mxu1 %v1907_v53 }
  0x47   :  { %1117 = vmatprep.subr.bf16.mxu0 %v1912_v52  ;;  %1199 = vmatprep.subr.bf16.mxu1 %v1915_v54 }
  0x4a   :  { %1118 = vmatpush1.bf16.msra.mxu0 %v1910_v55  ;;  %1200 = vmatpush1.bf16.msra.mxu1 %v1913_v57 }
  0x4b   :  { %1119 = vmatprep.subr.bf16.mxu0 %v1918_v56  ;;  %1201 = vmatprep.subr.bf16.mxu1 %v1921_v58 }
  0x4e   :  { %1120 = vmatpush1.bf16.msra.mxu0 %v1916_v59  ;;  %1202 = vmatpush1.bf16.msra.mxu1 %v1919_v61  ;;  %v1961_v61 = vld [vmem:[#allocation2 + $0x208] ss:$16 sps:$4 sm:$0xff]  }
  0x4f   :  { %1121 = vmatprep.subr.bf16.mxu0 %v1924_v60  ;;  %1203 = vmatprep.subr.bf16.mxu1 %v1927_v62  ;;  %v1958_v60 = vld [vmem:[#allocation2 + $0x200] ss:$16 sps:$4 sm:$0xff]  }
  0x52   :  { %1122 = vmatpush1.bf16.msra.mxu0 %v1922_v63  ;;  %1204 = vmatpush1.bf16.msra.mxu1 %v1925_v1  ;;  %v1969_v1 = vld [vmem:[#allocation2 + $0x22c] ss:$16 sps:$4 sm:$0xff]  }
  0x53   :  { %1123 = vmatprep.subr.bf16.mxu0 %v1930_v0  ;;  %1205 = vmatprep.subr.bf16.mxu1 %v1933_v2  ;;  %v1966_v0 = vld [vmem:[#allocation2 + $0x224] ss:$16 sps:$4 sm:$0xff]  }
  0x56   :  { %1124 = vmatpush1.bf16.msra.mxu0 %v1928_v3  ;;  %1206 = vmatpush1.bf16.msra.mxu1 %v1931_v5  ;;  %v1964_v3 = vld [vmem:[#allocation2 + $0x220] ss:$16 sps:$4 sm:$0xff]   ;;  %v1967_v5 = vld [vmem:[#allocation2 + $0x228] ss:$16 sps:$4 sm:$0xff]  }
  0x57   :  { %1125 = vmatprep.subr.bf16.mxu0 %v1936_v6  ;;  %1207 = vmatprep.subr.bf16.mxu1 %v1939_v7  ;;  %v1972_v6 = vld [vmem:[#allocation2 + $0x244] ss:$16 sps:$4 sm:$0xff]   ;;  %v1975_v7 = vld [vmem:[#allocation2 + $0x24c] ss:$16 sps:$4 sm:$0xff]  }
  0x5a   :  { %1126 = vmatpush1.bf16.msra.mxu0 %v1934_v8  ;;  %1208 = vmatpush1.bf16.msra.mxu1 %v1937_v9  ;;  %v1970_v8 = vld [vmem:[#allocation2 + $0x240] ss:$16 sps:$4 sm:$0xff]   ;;  %v1973_v9 = vld [vmem:[#allocation2 + $0x248] ss:$16 sps:$4 sm:$0xff]  }
  0x5b   :  { %1127 = vmatprep.subr.bf16.mxu0 %v1942_v11  ;;  %1209 = vmatprep.subr.bf16.mxu1 %v1945_v13  ;;  %v1981_v11 = vld [vmem:[#allocation2 + $0x26c] ss:$16 sps:$4 sm:$0xff]   ;;  %v1979_v13 = vld [vmem:[#allocation2 + $0x268] ss:$16 sps:$4 sm:$0xff]  }
  0x5e   :  { %1128 = vmatpush1.bf16.msra.mxu0 %v1940_v10  ;;  %1210 = vmatpush1.bf16.msra.mxu1 %v1943_v12  ;;  %v1978_v10 = vld [vmem:[#allocation2 + $0x264] ss:$16 sps:$4 sm:$0xff]   ;;  %v1976_v12 = vld [vmem:[#allocation2 + $0x260] ss:$16 sps:$4 sm:$0xff]  }
  0x5f   :  { %1129 = vmatprep.subr.bf16.mxu0 %v1948_v14  ;;  %1211 = vmatprep.subr.bf16.mxu1 %v1951_v17  ;;  %v1984_v14 = vld [vmem:[#allocation2 + $0x284] ss:$16 sps:$4 sm:$0xff]   ;;  %v1985_v17 = vld [vmem:[#allocation2 + $0x288] ss:$16 sps:$4 sm:$0xff]  }
  0x62   :  { %1130 = vmatpush1.bf16.msra.mxu0 %v1946_v15  ;;  %1212 = vmatpush1.bf16.msra.mxu1 %v1949_v16  ;;  %v1987_v15 = vld [vmem:[#allocation2 + $0x28c] ss:$16 sps:$4 sm:$0xff]   ;;  %v1982_v16 = vld [vmem:[#allocation2 + $0x280] ss:$16 sps:$4 sm:$0xff]  }
  0x63   :  { %1131 = vmatprep.subr.bf16.mxu0 %v1954_v18  ;;  %1213 = vmatprep.subr.bf16.mxu1 %v1957_v19  ;;  %v1990_v18 = vld [vmem:[#allocation2 + $0x2a4] ss:$16 sps:$4 sm:$0xff]   ;;  %v1993_v19 = vld [vmem:[#allocation2 + $0x2ac] ss:$16 sps:$4 sm:$0xff]  }
  0x66   :  { %1132 = vmatpush1.bf16.msra.mxu0 %v1952_v20  ;;  %1214 = vmatpush1.bf16.msra.mxu1 %v1955_v21  ;;  %v1988_v20 = vld [vmem:[#allocation2 + $0x2a0] ss:$16 sps:$4 sm:$0xff]   ;;  %v1991_v21 = vld [vmem:[#allocation2 + $0x2a8] ss:$16 sps:$4 sm:$0xff]  }
  0x67   :  { %1142 = vmatprep.subr.bf16.mxu0 %v1960_v22  ;;  %1224 = vmatprep.subr.bf16.mxu1 %v1963_v23  ;;  %v1996_v22 = vld [vmem:[#allocation2 + $0x2c4] ss:$16 sps:$4 sm:$0xff]   ;;  %v1999_v23 = vld [vmem:[#allocation2 + $0x2cc] ss:$16 sps:$4 sm:$0xff]  }
  0xf4   :  { %v123_v24 = vpop.f32.mrb[0].mxu0  ;;  %v164_v27 = vpop.f32.mrb[0].mxu1 }
  0xf5   :  { %v125_v25 = vpop.f32.mrb[1].mxu0  ;;  %v166_v30 = vpop.f32.mrb[1].mxu1 }
  0xf6   :  { %v127_v26 = vpop.f32.mrb[2].mxu0  ;;  %v168_v33 = vpop.f32.mrb[2].mxu1 }
  0xf7   :  { %v128_v28 = vpop.f32.mrb[3].mxu0  ;;  %v169_v34 = vpop.f32.mrb[3].mxu1  ;;  %v2002_v26 = vld [vmem:[#allocation2 + $0x2e4] ss:$16 sps:$4 sm:$0xff]   ;;  %v2011_v33 = vld [vmem:[#allocation2 + $0x30c] ss:$16 sps:$4 sm:$0xff]  }
  0xf8   :  { %v2000_v28 = vld [vmem:[#allocation2 + $0x2e0] ss:$16 sps:$4 sm:$0xff]  }
  0xf9   :  { %v2006_v34 = vld [vmem:[#allocation2 + $0x300] ss:$16 sps:$4 sm:$0xff]  }
  0xfc   :  { %v229_v38 = vpop.f32.mrb[4].mxu0  ;;  %v270_v45 = vpop.f32.mrb[4].mxu1 }
  0xfd   :  { %v230_v40 = vadd.f32 %v229_v38, %v123_v24  ;;  %v231_v41 = vpop.f32.mrb[5].mxu0  ;;  %v271_v49 = vadd.f32 %v270_v45, %v164_v27  ;;  %v272_v50 = vpop.f32.mrb[5].mxu1  ;;  %v1994_v24 = vld [vmem:[#allocation2 + $0x2c0] ss:$16 sps:$4 sm:$0xff]   ;;  %v2005_v27 = vld [vmem:[#allocation2 + $0x2ec] ss:$16 sps:$4 sm:$0xff]  }
  0xfe   :  { %v232_v43 = vadd.f32 %v231_v41, %v125_v25  ;;  %v233_v44 = vpop.f32.mrb[6].mxu0  ;;  %v273_v52 = vadd.f32 %v272_v50, %v166_v30  ;;  %v274_v53 = vpop.f32.mrb[6].mxu1  ;;  %v1997_v25 = vld [vmem:[#allocation2 + $0x2c8] ss:$16 sps:$4 sm:$0xff]   ;;  %v2014_v38 = vld [vmem:[#allocation2 + $0x324] ss:$16 sps:$4 sm:$0xff]  }
  0xff   :  { %v299_v47 = vadd.f32 %v282_v37, %v230_v40  ;;  %v234_v48 = vpop.f32.mrb[7].mxu0  ;;  %v2220_v55 = vadd.f32 %v290_v42, %v271_v49  ;;  %v275_v56 = vpop.f32.mrb[7].mxu1  ;;  %v2003_v30 = vld [vmem:[#allocation2 + $0x2e8] ss:$16 sps:$4 sm:$0xff]   ;;  %v2012_v40 = vld [vmem:[#allocation2 + $0x320] ss:$16 sps:$4 sm:$0xff]  }
 0x100   :  { %v300_v51 = vadd.f32 %v286_v39, %v232_v43  ;;  %v302_v58 = vadd.f32 %v294_v46, %v273_v52  ;;  %v2009_v37 = vld [vmem:[#allocation2 + $0x308] ss:$16 sps:$4 sm:$0xff]   ;;  %v2017_v39 = vld [vmem:[#allocation2 + $0x32c] ss:$16 sps:$4 sm:$0xff]   ;;  %v2020_v42 = vld [vmem:[#allocation2 + $0x344] ss:$16 sps:$4 sm:$0xff]  }
 0x101   :  { %v303_v54 = vmax.f32 %v299_v47, 0.0  ;;  %v2015_v41 = vld [vmem:[#allocation2 + $0x328] ss:$16 sps:$4 sm:$0xff]   ;;  %v2023_v43 = vld [vmem:[#allocation2 + $0x34c] ss:$16 sps:$4 sm:$0xff]  }
 0x102   :  { %v304_v57 = vmax.f32 %v300_v51, 0.0  ;;  %v306_v62 = vmax.f32 %v302_v58, 0.0  ;;  %v2018_v44 = vld [vmem:[#allocation2 + $0x340] ss:$16 sps:$4 sm:$0xff]   ;;  %v2021_v45 = vld [vmem:[#allocation2 + $0x348] ss:$16 sps:$4 sm:$0xff]  }
 0x103   :  { %v307_v63 = vpack.c.bf16 %v303_v54, %v303_v54  ;;  %v2026_v46 = vld [vmem:[#allocation2 + $0x364] ss:$16 sps:$4 sm:$0xff]   ;;  %v2029_v47 = vld [vmem:[#allocation2 + $0x36c] ss:$16 sps:$4 sm:$0xff]   ;;  %v2024_v48 = vld [vmem:[#allocation2 + $0x360] ss:$16 sps:$4 sm:$0xff]  }
 0x104   :  { %v308_v59 = vpack.c.bf16 %v304_v57, %v304_v57  ;;  %v310_v2 = vpack.c.bf16 %v306_v62, %v306_v62  ;;  %v2027_v49 = vld [vmem:[#allocation2 + $0x368] ss:$16 sps:$4 sm:$0xff]   ;;  %v2032_v50 = vld [vmem:[#allocation2 + $0x384] ss:$16 sps:$4 sm:$0xff]   ;;  %v2035_v51 = vld [vmem:[#allocation2 + $0x38c] ss:$16 sps:$4 sm:$0xff]  }
 0x105   :  { %v2030_v52 = vld [vmem:[#allocation2 + $0x380] ss:$16 sps:$4 sm:$0xff]   ;;  %v2033_v53 = vld [vmem:[#allocation2 + $0x388] ss:$16 sps:$4 sm:$0xff]   ;;  %v2038_v54 = vld [vmem:[#allocation2 + $0x3a4] ss:$16 sps:$4 sm:$0xff]  }
 0x106   :  { %1133 = vmatprep.mubr.bf16.mxu0 %v308_v59  ;;  %1215 = vmatprep.mubr.bf16.mxu1 %v308_v59  ;;  %v2041_v56 = vld [vmem:[#allocation2 + $0x3ac] ss:$16 sps:$4 sm:$0xff]   ;;  %v2036_v57 = vld [vmem:[#allocation2 + $0x3a0] ss:$16 sps:$4 sm:$0xff]   ;;  %v2039_v58 = vld [vmem:[#allocation2 + $0x3a8] ss:$16 sps:$4 sm:$0xff]  }
 0x107   :  { %1134 = vmatmul.mubr.bf16.vlgmr.msra.gmra.mrb[8].mxu0 %v307_v63  ;;  %1216 = vmatmul.mubr.bf16.vlgmr.msra.gmra.mrb[8].mxu1 %v307_v63  ;;  %v2044_v59 = vld [vmem:[#allocation2 + $0x3c4] ss:$16 sps:$4 sm:$0xff]   ;;  %v2045_v62 = vld [vmem:[#allocation2 + $0x3c8] ss:$16 sps:$4 sm:$0xff]  }
 0x108   :  { %1143 = vmatpush1.bf16.msra.mxu0 %v1958_v60  ;;  %1225 = vmatpush1.bf16.msra.mxu1 %v1961_v61  ;;  %v2047_v60 = vld [vmem:[#allocation2 + $0x3cc] ss:$16 sps:$4 sm:$0xff]   ;;  %v2042_v61 = vld [vmem:[#allocation2 + $0x3c0] ss:$16 sps:$4 sm:$0xff]   ;;  %v2050_v63 = vld [vmem:[#allocation2 + $0x3e4] ss:$16 sps:$4 sm:$0xff]  }
 0x109   :  { %1144 = vmatprep.subr.bf16.mxu0 %v1966_v0  ;;  %1226 = vmatprep.subr.bf16.mxu1 %v1969_v1  ;;  %v2053_v0 = vld [vmem:[#allocation2 + $0x3ec] ss:$16 sps:$4 sm:$0xff]   ;;  %v2048_v1 = vld [vmem:[#allocation2 + $0x3e0] ss:$16 sps:$4 sm:$0xff]  }
 0x10a   :  { %1174 = vmatprep.mubr.bf16.mxu0 %v310_v2  ;;  %1256 = vmatprep.mubr.bf16.mxu1 %v310_v2  ;;  %v2051_v2 = vld [vmem:[#allocation2 + $0x3e8] ss:$16 sps:$4 sm:$0xff]  }
 0x10c   :  { %1145 = vmatpush1.bf16.msra.mxu0 %v1964_v3  ;;  %1227 = vmatpush1.bf16.msra.mxu1 %v1967_v5  ;;  %v305_v3 = vmax.f32 %v2220_v55, 0.0  ;;  %v2054_v5 = vld [vmem:[%s2343_s7 + $0x40] sm:$0xff]  }
 0x10d   :  { %1146 = vmatprep.subr.bf16.mxu0 %v1972_v6  ;;  %1228 = vmatprep.subr.bf16.mxu1 %v1975_v7  ;;  %v2055_v6 = vld [vmem:[%s2343_s7 + $0xc0] sm:$0xff]  }
 0x10e   :  { %v2056_v7 = vld [vmem:[%s2343_s7] sm:$0xff]  }
 0x10f   :  { %v2057_v55 = vld [vmem:[%s2343_s7 + $0x80] sm:$0xff]  }
 0x110   :  { %1147 = vmatpush1.bf16.msra.mxu0 %v1970_v8  ;;  %1229 = vmatpush1.bf16.msra.mxu1 %v1973_v9  ;;  %v309_v8 = vpack.c.bf16 %v305_v3, %v305_v3  ;;  %v2058_v9 = vld [vmem:[%s2343_s7 + $0x48] sm:$0xff]  }
 0x111   :  { %1148 = vmatprep.subr.bf16.mxu0 %v1978_v10  ;;  %1230 = vmatprep.subr.bf16.mxu1 %v1981_v11  ;;  %v2059_v10 = vld [vmem:[%s2343_s7 + $0xc8] sm:$0xff]  }
 0x112   :  { %v2060_v11 = vld [vmem:[%s2343_s7 + $0x8] sm:$0xff]  }
 0x114   :  { %1149 = vmatpush1.bf16.msra.mxu0 %v1976_v12  ;;  %1231 = vmatpush1.bf16.msra.mxu1 %v1979_v13  ;;  %v2061_v12 = vld [vmem:[%s2343_s7 + $0x88] sm:$0xff]   ;;  %v2062_v13 = vld [vmem:[%s2343_s7 + $0x50] sm:$0xff]  }
 0x115   :  { %1150 = vmatprep.subr.bf16.mxu0 %v1984_v14  ;;  %1232 = vmatprep.subr.bf16.mxu1 %v1987_v15  ;;  %v2063_v14 = vld [vmem:[%s2343_s7 + $0xd0] sm:$0xff]  }
 0x116   :  { %v2064_v15 = vld [vmem:[%s2343_s7 + $0x10] sm:$0xff]  }
 0x118   :  { %1151 = vmatpush1.bf16.msra.mxu0 %v1982_v16  ;;  %1233 = vmatpush1.bf16.msra.mxu1 %v1985_v17  ;;  %v2065_v16 = vld [vmem:[%s2343_s7 + $0x90] sm:$0xff]   ;;  %v2066_v17 = vld [vmem:[%s2343_s7 + $0x58] sm:$0xff]  }
 0x119   :  { %1152 = vmatprep.subr.bf16.mxu0 %v1990_v18  ;;  %1234 = vmatprep.subr.bf16.mxu1 %v1993_v19  ;;  %v2067_v18 = vld [vmem:[%s2343_s7 + $0xd8] sm:$0xff]  }
 0x11a   :  { %v2068_v19 = vld [vmem:[%s2343_s7 + $0x18] sm:$0xff]  }
 0x11c   :  { %1153 = vmatpush1.bf16.msra.mxu0 %v1988_v20  ;;  %1235 = vmatpush1.bf16.msra.mxu1 %v1991_v21  ;;  %v2069_v20 = vld [vmem:[%s2343_s7 + $0x98] sm:$0xff]   ;;  %v2070_v21 = vld [vmem:[%s2343_s7 + $0x60] sm:$0xff]  }
 0x11d   :  { %1154 = vmatprep.subr.bf16.mxu0 %v1996_v22  ;;  %1236 = vmatprep.subr.bf16.mxu1 %v1999_v23  ;;  %v2071_v22 = vld [vmem:[%s2343_s7 + $0xe0] sm:$0xff]  }
 0x11e   :  { %v2072_v23 = vld [vmem:[%s2343_s7 + $0x20] sm:$0xff]  }
 0x120   :  { %1155 = vmatpush1.bf16.msra.mxu0 %v1994_v24  ;;  %1237 = vmatpush1.bf16.msra.mxu1 %v1997_v25  ;;  %v2073_v24 = vld [vmem:[%s2343_s7 + $0xa0] sm:$0xff]   ;;  %v2074_v25 = vld [vmem:[%s2343_s7 + $0x68] sm:$0xff]  }
 0x121   :  { %1156 = vmatprep.subr.bf16.mxu0 %v2002_v26  ;;  %1238 = vmatprep.subr.bf16.mxu1 %v2005_v27  ;;  %v2075_v26 = vld [vmem:[%s2343_s7 + $0xe8] sm:$0xff]  }
 0x122   :  { %v2076_v27 = vld [vmem:[%s2343_s7 + $0x28] sm:$0xff]  }
 0x124   :  { %1157 = vmatpush1.bf16.msra.mxu0 %v2000_v28  ;;  %1239 = vmatpush1.bf16.msra.mxu1 %v2003_v30  ;;  %v2077_v28 = vld [vmem:[%s2343_s7 + $0xa8] sm:$0xff]   ;;  %v2078_v30 = vld [vmem:[%s2343_s7 + $0x70] sm:$0xff]  }
 0x125   :  { %1158 = vmatprep.subr.bf16.mxu0 %v2008_v31  ;;  %1240 = vmatprep.subr.bf16.mxu1 %v2011_v33  ;;  %v2079_v31 = vld [vmem:[%s2343_s7 + $0xf0] sm:$0xff]  }
 0x126   :  { %v2080_v33 = vld [vmem:[%s2343_s7 + $0x30] sm:$0xff]  }
 0x128   :  { %1159 = vmatpush1.bf16.msra.mxu0 %v2006_v34  ;;  %1241 = vmatpush1.bf16.msra.mxu1 %v2009_v37  ;;  %v2081_v34 = vld [vmem:[%s2343_s7 + $0xb0] sm:$0xff]   ;;  %v2082_v37 = vld [vmem:[%s2343_s7 + $0x78] sm:$0xff]  }
 0x129   :  { %1160 = vmatprep.subr.bf16.mxu0 %v2014_v38  ;;  %1242 = vmatprep.subr.bf16.mxu1 %v2017_v39  ;;  %v2083_v38 = vld [vmem:[%s2343_s7 + $0xf8] sm:$0xff]  }
 0x12a   :  { %v2084_v39 = vld [vmem:[%s2343_s7 + $0x38] sm:$0xff]  }
 0x12c   :  { %1161 = vmatpush1.bf16.msra.mxu0 %v2012_v40  ;;  %1243 = vmatpush1.bf16.msra.mxu1 %v2015_v41  ;;  %v2085_v40 = vld [vmem:[%s2343_s7 + $0xb8] sm:$0xff]   ;;  %v439_v41 = vld [vmem:[%s2342_s6] sm:$0xf] }
 0x12d   :  { %1162 = vmatprep.subr.bf16.mxu0 %v2020_v42  ;;  %1244 = vmatprep.subr.bf16.mxu1 %v2023_v43  ;;  %v444_v42 = vrot.slane %v439_v41, %v281_v29  ;;  %v452_v43 = vrot.slane %v439_v41, %v289_v35 }
 0x130   :  { %1163 = vmatpush1.bf16.msra.mxu0 %v2018_v44  ;;  %1245 = vmatpush1.bf16.msra.mxu1 %v2021_v45  ;;  %v448_v44 = vrot.slane %v439_v41, %v285_v32  ;;  %v456_v45 = vrot.slane %v439_v41, %v293_v36 }
 0x131   :  { %1164 = vmatprep.subr.bf16.mxu0 %v2026_v46  ;;  %1246 = vmatprep.subr.bf16.mxu1 %v2029_v47 }
 0x134   :  { %1165 = vmatpush1.bf16.msra.mxu0 %v2024_v48  ;;  %1247 = vmatpush1.bf16.msra.mxu1 %v2027_v49 }
 0x135   :  { %1166 = vmatprep.subr.bf16.mxu0 %v2032_v50  ;;  %1248 = vmatprep.subr.bf16.mxu1 %v2035_v51 }
 0x138   :  { %1167 = vmatpush1.bf16.msra.mxu0 %v2030_v52  ;;  %1249 = vmatpush1.bf16.msra.mxu1 %v2033_v53 }
 0x139   :  { %1168 = vmatprep.subr.bf16.mxu0 %v2038_v54  ;;  %1250 = vmatprep.subr.bf16.mxu1 %v2041_v56 }
 0x13c   :  { %1169 = vmatpush1.bf16.msra.mxu0 %v2036_v57  ;;  %1251 = vmatpush1.bf16.msra.mxu1 %v2039_v58 }
 0x13d   :  { %1170 = vmatprep.subr.bf16.mxu0 %v2044_v59  ;;  %1252 = vmatprep.subr.bf16.mxu1 %v2047_v60 }
 0x140   :  { %1171 = vmatpush1.bf16.msra.mxu0 %v2042_v61  ;;  %1253 = vmatpush1.bf16.msra.mxu1 %v2045_v62 }
 0x141   :  { %1172 = vmatprep.subr.bf16.mxu0 %v2050_v63  ;;  %1254 = vmatprep.subr.bf16.mxu1 %v2053_v0  ;;  %v1761_v0 = vld [vmem:[%s2344_s8] ss:$0 sm:$0xff] }
 0x144   :  { %1173 = vmatpush1.bf16.msra.mxu0 %v2048_v1  ;;  %1255 = vmatpush1.bf16.msra.mxu1 %v2051_v2 }
 0x145   :  { %1794 = vmatprep.subr.bf16.mxu0 %v2054_v5  ;;  %1816 = vmatprep.subr.bf16.mxu1 %v2055_v6 }
 0x147   :  { %1175 = vmatmul.mubr.bf16.vlgmr.msra.gmra.mrb[8].mxu0 %v309_v8  ;;  %1257 = vmatmul.mubr.bf16.vlgmr.msra.gmra.mrb[8].mxu1 %v309_v8 }
 0x148   :  { %1795 = vmatpush3.bf16.msra.mxu0 %v2056_v7  ;;  %1817 = vmatpush3.bf16.msra.mxu1 %v2057_v55 }
 0x149   :  { %1796 = vmatprep.subr.bf16.mxu0 %v2058_v9  ;;  %1818 = vmatprep.subr.bf16.mxu1 %v2059_v10 }
 0x14c   :  { %1797 = vmatpush3.bf16.msra.mxu0 %v2060_v11  ;;  %1819 = vmatpush3.bf16.msra.mxu1 %v2061_v12 }
 0x14d   :  { %1798 = vmatprep.subr.bf16.mxu0 %v2062_v13  ;;  %1820 = vmatprep.subr.bf16.mxu1 %v2063_v14 }
 0x150   :  { %1799 = vmatpush3.bf16.msra.mxu0 %v2064_v15  ;;  %1821 = vmatpush3.bf16.msra.mxu1 %v2065_v16 }
 0x151   :  { %1800 = vmatprep.subr.bf16.mxu0 %v2066_v17  ;;  %1822 = vmatprep.subr.bf16.mxu1 %v2067_v18 }
 0x154   :  { %1801 = vmatpush3.bf16.msra.mxu0 %v2068_v19  ;;  %1823 = vmatpush3.bf16.msra.mxu1 %v2069_v20 }
 0x155   :  { %1802 = vmatprep.subr.bf16.mxu0 %v2070_v21  ;;  %1824 = vmatprep.subr.bf16.mxu1 %v2071_v22 }
 0x158   :  { %1803 = vmatpush3.bf16.msra.mxu0 %v2072_v23  ;;  %1825 = vmatpush3.bf16.msra.mxu1 %v2073_v24 }
 0x159   :  { %1804 = vmatprep.subr.bf16.mxu0 %v2074_v25  ;;  %1826 = vmatprep.subr.bf16.mxu1 %v2075_v26 }
 0x15c   :  { %1805 = vmatpush3.bf16.msra.mxu0 %v2076_v27  ;;  %1827 = vmatpush3.bf16.msra.mxu1 %v2077_v28 }
 0x15d   :  { %1806 = vmatprep.subr.bf16.mxu0 %v2078_v30  ;;  %1828 = vmatprep.subr.bf16.mxu1 %v2079_v31 }
 0x160   :  { %1807 = vmatpush3.bf16.msra.mxu0 %v2080_v33  ;;  %1829 = vmatpush3.bf16.msra.mxu1 %v2081_v34 }
 0x161   :  { %1808 = vmatprep.subr.bf16.mxu0 %v2082_v37  ;;  %1830 = vmatprep.subr.bf16.mxu1 %v2083_v38 }
 0x164   :  { %1809 = vmatpush3.bf16.msra.mxu0 %v2084_v39  ;;  %1831 = vmatpush3.bf16.msra.mxu1 %v2085_v40 }
 0x21a   :  { %v1176_v46 = vpop.f32.mrb[8].mxu0  ;;  %v1258_v47 = vpop.f32.mrb[8].mxu1 }
 0x21b   :  { %v1838_v48 = vadd.f32 %v1176_v46, %v444_v42  ;;  %v1840_v49 = vadd.f32 %v1258_v47, %v452_v43  ;;  %v1178_v50 = vpop.f32.mrb[9].mxu0  ;;  %v1260_v51 = vpop.f32.mrb[9].mxu1 }
 0x21c   :  { %v1839_v52 = vadd.f32 %v1178_v50, %v448_v44  ;;  %v1841_v53 = vadd.f32 %v1260_v51, %v456_v45  ;;  %v1180_v54 = vpop.f32.mrb[10].mxu0  ;;  %v1262_v56 = vpop.f32.mrb[10].mxu1 }
 0x21d   :  { %v1265_v29 = vmax.f32 %v1838_v48, 0.0  ;;  %v1267_v57 = vmax.f32 %v1840_v49, 0.0  ;;  %v1181_v58 = vpop.f32.mrb[11].mxu0  ;;  %v1263_v35 = vpop.f32.mrb[11].mxu1 }
 0x21e   :  { %v1266_v59 = vmax.f32 %v1839_v52, 0.0  ;;  %v1268_v60 = vmax.f32 %v1841_v53, 0.0 }
 0x21f   :  { %v1269_v4 = vpack.c.bf16 %v1265_v29, %v1265_v29  ;;  %v1271_v36 = vpack.c.bf16 %v1267_v57, %v1267_v57 }
 0x220   :  { %v1270_v32 = vpack.c.bf16 %v1266_v59, %v1266_v59  ;;  %v1272_v61 = vpack.c.bf16 %v1268_v60, %v1268_v60 }
 0x222   :  { %1568 = vmatprep.mubr.bf16.mxu0 %v1270_v32  ;;  %1608 = vmatprep.mubr.bf16.mxu1 %v1272_v61 }
 0x223   :  { %1569 = vmatmul.mubr.bf16.vlgmr.msra.gmra.mrb[12].mxu0 %v1269_v4  ;;  %1609 = vmatmul.mubr.bf16.vlgmr.msra.gmra.mrb[12].mxu1 %v1271_v36 }
 0x2f6   :  { %v1810_v62 = vpop.f32.mrb[12].mxu0  ;;  %v1832_v63 = vpop.f32.mrb[12].mxu1 }
 0x2f7   :  { %v1811_v1 = vpop.f32.mrb[13].mxu0  ;;  %v1833_v2 = vpop.f32.mrb[13].mxu1 }
 0x2f8   :  { %v1812_v3 = vadd.f32 %v1811_v1, %v1810_v62  ;;  %v1834_v5 = vadd.f32 %v1833_v2, %v1832_v63  ;;  %v1813_v6 = vpop.f32.mrb[14].mxu0  ;;  %v1835_v7 = vpop.f32.mrb[14].mxu1 }
 0x2f9   :  { %v1814_v55 = vpop.f32.mrb[15].mxu0  ;;  %v1836_v8 = vpop.f32.mrb[15].mxu1 }
 0x2fa   :  { %v1571_v9 = vadd.f32 %v1812_v3, %v1761_v0 }
 0x2fc   :  { %v1611_v10 = vadd.f32 %v1834_v5, %v1571_v9 }
 0x2fe   :  { %1617 = vst.msk [vmem:[%s2345_s9] sm:$0xff] %vm1616_vm3, %v1611_v10 }
 0x2ff   :  { %1622 = vsyncpa [#allocation3], 1 }

</bundles_post_ra>
